<compile_context>
chip_gen: v5e
topology: v5e:2x2
jax: 0.10.0
libtpu: 0.0.40
codegen_flags: <defaults>
</compile_context>

<pallas_src>
import functools

import jax
import jax.numpy as jnp
from jax.experimental import pallas as pl
from jax.experimental.pallas import tpu as pltpu

LANE = 128
NEG_BIG = -1e30  # masks padded logit columns out of the softmax normalizer


def _round_up(n, m):
    return (n + m - 1) // m * m


def mlp_logsoftmax_kernel(x_ref, w1_ref, b1_ref, w2_ref, b2_ref, o_ref):
    # In-kernel cast to the MXU-native dtype: x travels HBM->VMEM in its
    # producer dtype (no extra XLA cast pass); the cast is a cheap VPU op.
    x = x_ref[...].astype(jnp.bfloat16)                        # (TB, 784)

    # fc1: bf16 MXU inputs, fp32 accumulation; bias + ReLU in fp32.
    h = jnp.dot(x, w1_ref[...], preferred_element_type=jnp.float32)
    h = jnp.maximum(h + b1_ref[...], 0.0)                      # (TB, 128) f32

    # TODO(synk): nn.Dropout is identity in eval mode; training-mode dropout
    # (pltpu.prng_seed/prng_random_bits mask + 1/(1-p) scale) not implemented.

    # fc2: bf16 MXU inputs again, fp32 accumulation. Padded hidden rows of w2
    # are zero; padded logit columns carry a -1e30 bias so exp() underflows
    # to 0 and the log_softmax normalizer only sees the 10 real columns.
    logits = jnp.dot(h.astype(jnp.bfloat16), w2_ref[...],
                     preferred_element_type=jnp.float32)
    logits = logits + b2_ref[...]                              # (TB, 128) f32

    # Numerically stable log_softmax over the last (lane) axis, in fp32.
    m = jnp.max(logits, axis=-1, keepdims=True)
    shifted = logits - m
    lse = jnp.log(jnp.sum(jnp.exp(shifted), axis=-1, keepdims=True))
    o_ref[...] = (shifted - lse).astype(o_ref.dtype)           # lane-dense store


def prepare_params(w1, b1, w2, b2):
    """One-time layout/dtype prep (call once, outside the per-call hot path).

    w1: (784, H), b1: (H,), w2: (H, 10), b2: (10,) — already transposed vs
    PyTorch. Returns bf16 weights padded to 128-wide hidden/logit dims and
    fp32 biases (padded logit columns biased to -1e30).
    """
    K, H = w1.shape
    O = w2.shape[1]
    Hp = _round_up(max(H, LANE), LANE)
    Op = _round_up(max(O, LANE), LANE)

    w1p = jnp.zeros((K, Hp), jnp.bfloat16).at[:, :H].set(w1.astype(jnp.bfloat16))
    b1p = jnp.zeros((1, Hp), jnp.float32).at[:, :H].set(b1.astype(jnp.float32))
    w2p = jnp.zeros((Hp, Op), jnp.bfloat16).at[:H, :O].set(w2.astype(jnp.bfloat16))
    b2p = jnp.full((1, Op), NEG_BIG, jnp.float32).at[:, :O].set(b2.astype(jnp.float32))
    return w1p, b1p, w2p, b2p


@functools.partial(jax.jit, static_argnames=("tile_b",))
def net_forward(x, w1p, b1p, w2p, b2p, *, tile_b=1024):
    """x: (B, 1, 28, 28) or (B, 784), any float dtype. Returns (B, 10) fp32 log-probs."""
    B = x.shape[0]
    K, Hp = w1p.shape
    Op = w2p.shape[1]

    # Free metadata reshape; x keeps its producer dtype (no bf16 copy in HBM).
    x2d = x.reshape(B, K)

    # Batch-tile selection (all static):
    #  * sublane granularity follows x's in-kernel block dtype,
    #  * no jnp.pad — ragged final block is clamped by Pallas,
    #  * for B >= 512 force >= 2 grid steps so both v7x TensorCores get work.
    sub = max(8, 32 // jnp.dtype(x2d.dtype).itemsize)   # f32->8, bf16->16, 8bit->32
    tb_full = _round_up(B, sub)
    if B >= 512 and tb_full <= tile_b:
        tb = _round_up(-(-B // 2), sub)
    else:
        tb = min(tile_b, tb_full)
    nb = pl.cdiv(B, tb)

    out = pl.pallas_call(
        mlp_logsoftmax_kernel,
        out_shape=jax.ShapeDtypeStruct((B, Op), jnp.float32),
        grid_spec=pltpu.PrefetchScalarGridSpec(
            num_scalar_prefetch=0,
            grid=(nb,),
            in_specs=[
                pl.BlockSpec((tb, K), lambda i: (i, 0)),      # x tile (pipelined)
                pl.BlockSpec((K, Hp), lambda i: (0, 0)),      # w1 resident
                pl.BlockSpec((1, Hp), lambda i: (0, 0)),      # b1 resident
                pl.BlockSpec((Hp, Op), lambda i: (0, 0)),     # w2 resident
                pl.BlockSpec((1, Op), lambda i: (0, 0)),      # b2 resident
            ],
            out_specs=pl.BlockSpec((tb, Op), lambda i: (i, 0)),
        ),
        compiler_params=pltpu.CompilerParams(
            dimension_semantics=("parallel",)),  # batch axis shards across v7x's 2 TCs
    )(x2d, w1p, b1p, w2p, b2p)

    return out[:, :10]


def init_params(key, hidden_size):
    """Deterministic init matching nn.Linear shapes (stored transposed)."""
    k1, k2, k3, k4 = jax.random.split(key, 4)
    # PyTorch nn.Linear uses U(-1/sqrt(fan_in), 1/sqrt(fan_in)); mimic that.
    lim1 = 1.0 / jnp.sqrt(784.0)
    lim2 = 1.0 / jnp.sqrt(float(hidden_size))
    w1 = jax.random.uniform(k1, (784, hidden_size), jnp.float32, -lim1, lim1)
    b1 = jax.random.uniform(k2, (hidden_size,), jnp.float32, -lim1, lim1)
    w2 = jax.random.uniform(k3, (hidden_size, 10), jnp.float32, -lim2, lim2)
    b2 = jax.random.uniform(k4, (10,), jnp.float32, -lim2, lim2)
    return w1, b1, w2, b2


if __name__ == "__main__":
    key = jax.random.PRNGKey(0)
    k_x, k_p = jax.random.split(key)

    B = 8
    HIDDEN = 32  # params['hidden_size']
    # params['dropout_rate'] is irrelevant at inference (identity).

    x = jax.random.normal(k_x, (B, 1, 28, 28), jnp.float32)
    w1, b1, w2, b2 = init_params(k_p, HIDDEN)

    # One-time weight prep (padding + bf16 cast) outside the per-call path.
    w1p, b1p, w2p, b2p = prepare_params(w1, b1, w2, b2)

    out = net_forward(x, w1p, b1p, w2p, b2p)
    out = jax.block_until_ready(out)

    # Reference with matching bf16-in / fp32-accumulate matmul semantics.
    x2d = x.reshape(B, 784)
    h_ref = jnp.maximum(
        jnp.dot(x2d.astype(jnp.bfloat16), w1.astype(jnp.bfloat16),
                preferred_element_type=jnp.float32) + b1, 0.0)
    logits_ref = jnp.dot(h_ref.astype(jnp.bfloat16), w2.astype(jnp.bfloat16),
                         preferred_element_type=jnp.float32) + b2
    ref = jax.nn.log_softmax(logits_ref, axis=1)

    assert out.shape == (B, 10)
    assert jnp.allclose(out, ref, atol=5e-3, rtol=5e-3), \
        float(jnp.max(jnp.abs(out - ref)))
    # log-probs should sum (in prob space) to ~1 per row; also proves the
    # padded logit columns were correctly excluded from the normalizer.
    assert jnp.allclose(jnp.sum(jnp.exp(out), axis=1), 1.0, atol=1e-4)

    print("KERNEL_OK")
</pallas_src>

<mosaic_0001>
module attributes {stable_mosaic.version = 11 : i64} {
  func.func @mlp_logsoftmax_kernel(%arg0: i32, %arg1: memref<8x784xf32, #tpu.memory_space<vmem>>, %arg2: memref<784x128xbf16, #tpu.memory_space<vmem>>, %arg3: memref<1x128xf32, #tpu.memory_space<vmem>>, %arg4: memref<128x128xbf16, #tpu.memory_space<vmem>>, %arg5: memref<1x128xf32, #tpu.memory_space<vmem>>, %arg6: memref<8x128xf32, #tpu.memory_space<vmem>>) attributes {dimension_semantics = [#tpu.dimension_semantics<parallel>], iteration_bounds = array<i64: 1>, scalar_prefetch = 0 : i64, scratch_operands = 0 : i64, tpu.core_type = #tpu.core_type<tc>, window_params = [{transform_indices = @transform_0, window_bounds = array<i64: 8, 784>}, {pipeline_mode = #tpu.pipeline_mode<synchronous>, transform_indices = @transform_1, window_bounds = array<i64: 784, 128>}, {pipeline_mode = #tpu.pipeline_mode<synchronous>, transform_indices = @transform_2, window_bounds = array<i64: 1, 128>}, {pipeline_mode = #tpu.pipeline_mode<synchronous>, transform_indices = @transform_3, window_bounds = array<i64: 128, 128>}, {pipeline_mode = #tpu.pipeline_mode<synchronous>, transform_indices = @transform_4, window_bounds = array<i64: 1, 128>}, {transform_indices = @transform_5, window_bounds = array<i64: 8, 128>}]} {
    %c0 = arith.constant 0 : index
    %c0_0 = arith.constant 0 : index
    %0 = vector.load %arg1[%c0, %c0_0] : memref<8x784xf32, #tpu.memory_space<vmem>>, vector<8x784xf32>
    %1 = arith.truncf %0 : vector<8x784xf32> to vector<8x784xbf16>
    %c0_1 = arith.constant 0 : index
    %c0_2 = arith.constant 0 : index
    %2 = vector.load %arg2[%c0_1, %c0_2] : memref<784x128xbf16, #tpu.memory_space<vmem>>, vector<784x128xbf16>
    %cst = arith.constant dense<0.000000e+00> : vector<8x128xf32>
    %3 = tpu.matmul %1, %2, %cst {dimension_numbers = #tpu.dot_dimension_numbers<[1], [0], [0], [1], [0, 0, 1, 1], [], []>} : vector<8x784xbf16>, vector<784x128xbf16>, vector<8x128xf32> -> vector<8x128xf32>
    %c0_3 = arith.constant 0 : index
    %c0_4 = arith.constant 0 : index
    %4 = vector.load %arg3[%c0_3, %c0_4] : memref<1x128xf32, #tpu.memory_space<vmem>>, vector<1x128xf32>
    %5 = vector.broadcast %4 : vector<1x128xf32> to vector<8x128xf32>
    %6 = arith.addf %3, %5 : vector<8x128xf32>
    %cst_5 = arith.constant 0.000000e+00 : f32
    %7 = vector.broadcast %cst_5 : f32 to vector<8x128xf32>
    %8 = arith.maximumf %6, %7 : vector<8x128xf32>
    %9 = arith.truncf %8 : vector<8x128xf32> to vector<8x128xbf16>
    %c0_6 = arith.constant 0 : index
    %c0_7 = arith.constant 0 : index
    %10 = vector.load %arg4[%c0_6, %c0_7] : memref<128x128xbf16, #tpu.memory_space<vmem>>, vector<128x128xbf16>
    %cst_8 = arith.constant dense<0.000000e+00> : vector<8x128xf32>
    %11 = tpu.matmul %9, %10, %cst_8 {dimension_numbers = #tpu.dot_dimension_numbers<[1], [0], [0], [1], [0, 0, 1, 1], [], []>} : vector<8x128xbf16>, vector<128x128xbf16>, vector<8x128xf32> -> vector<8x128xf32>
    %c0_9 = arith.constant 0 : index
    %c0_10 = arith.constant 0 : index
    %12 = vector.load %arg5[%c0_9, %c0_10] : memref<1x128xf32, #tpu.memory_space<vmem>>, vector<1x128xf32>
    %13 = vector.broadcast %12 : vector<1x128xf32> to vector<8x128xf32>
    %14 = arith.addf %11, %13 : vector<8x128xf32>
    %cst_11 = arith.constant dense<0xFF800000> : vector<8xf32>
    %15 = vector.multi_reduction <maximumf>, %14, %cst_11 [1] : vector<8x128xf32> to vector<8xf32>
    %16 = vector.shape_cast %15 : vector<8xf32> to vector<8x1xf32>
    %17 = vector.broadcast %16 : vector<8x1xf32> to vector<8x128xf32>
    %18 = arith.subf %14, %17 : vector<8x128xf32>
    %19 = math.exp %18 : vector<8x128xf32>
    %cst_12 = arith.constant dense<0.000000e+00> : vector<8xf32>
    %20 = vector.multi_reduction <add>, %19, %cst_12 [1] : vector<8x128xf32> to vector<8xf32>
    %21 = vector.shape_cast %20 : vector<8xf32> to vector<8x1xf32>
    %22 = math.log %21 : vector<8x1xf32>
    %23 = vector.broadcast %22 : vector<8x1xf32> to vector<8x128xf32>
    %24 = arith.subf %18, %23 : vector<8x128xf32>
    %c0_13 = arith.constant 0 : index
    %c0_14 = arith.constant 0 : index
    %25 = vector.load %arg6[%c0_13, %c0_14] : memref<8x128xf32, #tpu.memory_space<vmem>>, vector<8x128xf32>
    tpu.vector_store %arg6[%c0_13, %c0_14], %24 {strides = array<i32>} : memref<8x128xf32, #tpu.memory_space<vmem>>, vector<8x128xf32>,
    return
  }
  func.func @transform_0(%arg0: i32) -> (i32, i32) {
    %c0_i32 = arith.constant 0 : i32
    %c0_i32_0 = arith.constant 0 : i32
    return %arg0, %c0_i32 : i32, i32
  }
  func.func @transform_1(%arg0: i32) -> (i32, i32) {
    %c0_i32 = arith.constant 0 : i32
    %c0_i32_0 = arith.constant 0 : i32
    %c0_i32_1 = arith.constant 0 : i32
    return %c0_i32, %c0_i32_0 : i32, i32
  }
  func.func @transform_2(%arg0: i32) -> (i32, i32) {
    %c0_i32 = arith.constant 0 : i32
    %c0_i32_0 = arith.constant 0 : i32
    %c0_i32_1 = arith.constant 0 : i32
    return %c0_i32, %c0_i32_0 : i32, i32
  }
  func.func @transform_3(%arg0: i32) -> (i32, i32) {
    %c0_i32 = arith.constant 0 : i32
    %c0_i32_0 = arith.constant 0 : i32
    %c0_i32_1 = arith.constant 0 : i32
    return %c0_i32, %c0_i32_0 : i32, i32
  }
  func.func @transform_4(%arg0: i32) -> (i32, i32) {
    %c0_i32 = arith.constant 0 : i32
    %c0_i32_0 = arith.constant 0 : i32
    %c0_i32_1 = arith.constant 0 : i32
    return %c0_i32, %c0_i32_0 : i32, i32
  }
  func.func @transform_5(%arg0: i32) -> (i32, i32) {
    %c0_i32 = arith.constant 0 : i32
    %c0_i32_0 = arith.constant 0 : i32
    return %arg0, %c0_i32 : i32, i32
  }
}

</mosaic_0001>

<bundles_post_ra>
// kernel: net_forward.1
= control target key start
LH: loop header
LB: loop body
LE: loop exit
PB: predicated region body
PF: predicated region fallthrough
CT: control target
= control target key end

     0   :  { %s1188_s0 = inlined_call_operand.vmem [shape: f32[8,784], index: 0, kind: input, shape index: {}]   ;;  %s1189_s1 = inlined_call_operand.vmem [shape: bf16[784,128], index: 1, kind: input, shape index: {}]   ;;  %s1190_s2 = inlined_call_operand.vmem [shape: f32[1,128], index: 2, kind: input, shape index: {}]   ;;  %s1191_s3 = inlined_call_operand.vmem [shape: bf16[128,128], index: 3, kind: input, shape index: {}]   ;;  %s1192_s4 = inlined_call_operand.vmem [shape: f32[1,128], index: 4, kind: input, shape index: {}]   ;;  %s1193_s5 = inlined_call_operand.hbm [shape: f32[8,128], index: 5, kind: output, shape index: {}]  }
   0x1   :  { %v873_v0 = vld [vmem:[%s1189_s1 + $0x38] sm:$0xff]  ;;  %v872_v3 = vld [vmem:[%s1189_s1 + $0x30] sm:$0xff]  ;;  %v871_v8 = vld [vmem:[%s1189_s1 + $0x28] sm:$0xff] }
   0x2   :  { %v881_v1 = vld [vmem:[%s1189_s1 + $0x78] sm:$0xff]  ;;  %436 = vmatpush.bf16.msra.mxu0 %v873_v0  ;;  %v880_v4 = vld [vmem:[%s1189_s1 + $0x70] sm:$0xff]  ;;  %v879_v9 = vld [vmem:[%s1189_s1 + $0x68] sm:$0xff] }
   0x3   :  { %v889_v2 = vld [vmem:[%s1189_s1 + $0xb8] sm:$0xff]  ;;  %449 = vmatpush.bf16.msra.mxu1 %v881_v1  ;;  %v888_v5 = vld [vmem:[%s1189_s1 + $0xb0] sm:$0xff]  ;;  %v887_v10 = vld [vmem:[%s1189_s1 + $0xa8] sm:$0xff] }
   0x4   :  { %462 = vmatpush.bf16.msra.mxu2 %v889_v2  ;;  %v897_v6 = vld [vmem:[%s1189_s1 + $0xf8] sm:$0xff]  ;;  %v896_v7 = vld [vmem:[%s1189_s1 + $0xf0] sm:$0xff]  ;;  %v895_v11 = vld [vmem:[%s1189_s1 + $0xe8] sm:$0xff] }
   0x5   :  { %475 = vmatpush.bf16.msra.mxu3 %v897_v6  ;;  %v870_v12 = vld [vmem:[%s1189_s1 + $0x20] sm:$0xff]  ;;  %v869_v16 = vld [vmem:[%s1189_s1 + $0x18] sm:$0xff] }
   0x6   :  { %437 = vmatpush.bf16.msra.mxu0 %v872_v3  ;;  %v878_v13 = vld [vmem:[%s1189_s1 + $0x60] sm:$0xff]  ;;  %v877_v17 = vld [vmem:[%s1189_s1 + $0x58] sm:$0xff] }
   0x7   :  { %450 = vmatpush.bf16.msra.mxu1 %v880_v4  ;;  %v886_v14 = vld [vmem:[%s1189_s1 + $0xa0] sm:$0xff]  ;;  %v885_v18 = vld [vmem:[%s1189_s1 + $0x98] sm:$0xff] }
   0x8   :  { %463 = vmatpush.bf16.msra.mxu2 %v888_v5  ;;  %v894_v15 = vld [vmem:[%s1189_s1 + $0xe0] sm:$0xff] }
   0x9   :  { %476 = vmatpush.bf16.msra.mxu3 %v896_v7 }
   0xa   :  { %438 = vmatpush.bf16.msra.mxu0 %v871_v8 }
   0xb   :  { %451 = vmatpush.bf16.msra.mxu1 %v879_v9 }
   0xc   :  { %464 = vmatpush.bf16.msra.mxu2 %v887_v10 }
   0xd   :  { %477 = vmatpush.bf16.msra.mxu3 %v895_v11 }
   0xe   :  { %439 = vmatpush.bf16.msra.mxu0 %v870_v12 }
   0xf   :  { %452 = vmatpush.bf16.msra.mxu1 %v878_v13 }
  0x10   :  { %465 = vmatpush.bf16.msra.mxu2 %v886_v14 }
  0x11   :  { %10 = vsyncpa [#allocation3], 0  ;;  %478 = vmatpush.bf16.msra.mxu3 %v894_v15  ;;  %v893_v19 = vld [vmem:[%s1189_s1 + $0xd8] sm:$0xff]  ;;  %v868_v20 = vld [vmem:[%s1189_s1 + $0x10] sm:$0xff]  ;;  %vm432_vm0 = vcmask 130048   ;;  %s956_s21 = smov [#allocation2]  }
  0x12   :  { %440 = vmatpush.bf16.msra.mxu0 %v869_v16  ;;  %v876_v21 = vld [vmem:[%s1189_s1 + $0x50] sm:$0xff]  ;;  %v867_v24 = vld [vmem:[%s1189_s1 + $0x8] sm:$0xff]  ;;  %v866_v27 = vld [vmem:[%s1189_s1] sm:$0xff]  ;;  %s626_s22 = sshll.u32 %s956_s21, 4  ;;  %s628_s25 = sshll.u32 %s1193_s5, 4  ;;  %s627_s22 = int_to_ptr.vmem [resolvable:$true] %s626_s22  ;;  %s629_s25 = int_to_ptr.hbm [resolvable:$true] %s628_s25 }
  0x13   :  { %453 = vmatpush.bf16.msra.mxu1 %v877_v17  ;;  %v884_v22 = vld [vmem:[%s1189_s1 + $0x90] sm:$0xff]  ;;  %v875_v25 = vld [vmem:[%s1189_s1 + $0x48] sm:$0xff]  ;;  %v874_v29 = vld [vmem:[%s1189_s1 + $0x40] sm:$0xff] }
  0x14   :  { %466 = vmatpush.bf16.msra.mxu2 %v885_v18  ;;  %v892_v23 = vld [vmem:[%s1189_s1 + $0xd0] sm:$0xff]  ;;  %v883_v26 = vld [vmem:[%s1189_s1 + $0x88] sm:$0xff]  ;;  %v22_v30 = vld [vmem:[%s1188_s0] sm:$0xff] }
  0x15   :  { %479 = vmatpush.bf16.msra.mxu3 %v893_v19  ;;  %v891_v28 = vld [vmem:[%s1189_s1 + $0xc8] sm:$0xff]  ;;  %v905_v32 = vld [vmem:[%s1189_s1 + $0x138] sm:$0xff]  ;;  %v882_v34 = vld [vmem:[%s1189_s1 + $0x80] sm:$0xff]  ;;  %v29_v36 = vpack.c.bf16 %v22_v30, %v22_v30 }
  0x16   :  { %441 = vmatpush.bf16.msra.mxu0 %v868_v20  ;;  %v23_v31 = vld [vmem:[%s1188_s0 + $0x8] sm:$0xff]  ;;  %v913_v33 = vld [vmem:[%s1189_s1 + $0x178] sm:$0xff]  ;;  %v24_v35 = vld [vmem:[%s1188_s0 + $0x10] sm:$0xff] }
  0x17   :  { %454 = vmatpush.bf16.msra.mxu1 %v876_v21  ;;  %v30_v37 = vpack.c.bf16 %v23_v31, %v23_v31  ;;  %v890_v38 = vld [vmem:[%s1189_s1 + $0xc0] sm:$0xff]  ;;  %v25_v40 = vld [vmem:[%s1188_s0 + $0x18] sm:$0xff]  ;;  %v904_v41 = vld [vmem:[%s1189_s1 + $0x130] sm:$0xff]  ;;  %v31_v43 = vpack.c.bf16 %v24_v35, %v24_v35 }
  0x18   :  { %467 = vmatpush.bf16.msra.mxu2 %v884_v22  ;;  %v914_v39 = vld [vmem:[%s1189_s1 + $0x180] sm:$0xff]  ;;  %v912_v42 = vld [vmem:[%s1189_s1 + $0x170] sm:$0xff]  ;;  %v32_v44 = vpack.c.bf16 %v25_v40, %v25_v40  ;;  %v903_v45 = vld [vmem:[%s1189_s1 + $0x128] sm:$0xff] }
  0x19   :  { %480 = vmatpush.bf16.msra.mxu3 %v892_v23  ;;  %v911_v46 = vld [vmem:[%s1189_s1 + $0x168] sm:$0xff]  ;;  %v902_v47 = vld [vmem:[%s1189_s1 + $0x120] sm:$0xff]  ;;  %v901_v49 = vld [vmem:[%s1189_s1 + $0x118] sm:$0xff] }
  0x1a   :  { %442 = vmatpush.bf16.msra.mxu0 %v867_v24  ;;  %v910_v48 = vld [vmem:[%s1189_s1 + $0x160] sm:$0xff]  ;;  %v909_v50 = vld [vmem:[%s1189_s1 + $0x158] sm:$0xff]  ;;  %v28_v51 = vld [vmem:[%s1188_s0 + $0x30] sm:$0xff] }
  0x1b   :  { %455 = vmatpush.bf16.msra.mxu1 %v875_v25  ;;  %v900_v52 = vld [vmem:[%s1189_s1 + $0x110] sm:$0xff]  ;;  %v35_v54 = vpack.c.bf16 %v28_v51, %v28_v51  ;;  %v899_v55 = vld [vmem:[%s1189_s1 + $0x108] sm:$0xff]  ;;  %v898_v57 = vld [vmem:[%s1189_s1 + $0x100] sm:$0xff] }
  0x1c   :  { %468 = vmatpush.bf16.msra.mxu2 %v883_v26  ;;  %v908_v53 = vld [vmem:[%s1189_s1 + $0x150] sm:$0xff]  ;;  %v907_v56 = vld [vmem:[%s1189_s1 + $0x148] sm:$0xff]  ;;  %v906_v58 = vld [vmem:[%s1189_s1 + $0x140] sm:$0xff] }
  0x1d   :  { %481 = vmatpush.bf16.msra.mxu3 %v891_v28  ;;  %v26_v59 = vld [vmem:[%s1188_s0 + $0x20] sm:$0xff]  ;;  %v27_v60 = vld [vmem:[%s1188_s0 + $0x28] sm:$0xff]  ;;  %v922_v63 = vld [vmem:[%s1191_s3 + $0x38] sm:$0xff] }
  0x1e   :  { %443 = vmatpush.bf16.msra.mxu0 %v866_v27  ;;  %v33_v61 = vpack.c.bf16 %v26_v59, %v26_v59  ;;  %v34_v62 = vpack.c.bf16 %v27_v60, %v27_v60  ;;  %v921_v0 = vld [vmem:[%s1191_s3 + $0x30] sm:$0xff]  ;;  %v920_v1 = vld [vmem:[%s1191_s3 + $0x28] sm:$0xff]  ;;  %v919_v2 = vld [vmem:[%s1191_s3 + $0x20] sm:$0xff] }
  0x1f   :  { %456 = vmatpush.bf16.msra.mxu1 %v874_v29  ;;  %v918_v3 = vld [vmem:[%s1191_s3 + $0x18] sm:$0xff]  ;;  %v917_v4 = vld [vmem:[%s1191_s3 + $0x10] sm:$0xff]  ;;  %v916_v5 = vld [vmem:[%s1191_s3 + $0x8] sm:$0xff] }
  0x20   :  { %469 = vmatpush.bf16.msra.mxu2 %v882_v34  ;;  %v915_v8 = vld [vmem:[%s1191_s3] sm:$0xff] }
  0x21   :  { %444 = vmatmul.bf16.vlgmr.msra.gmra.mxu0 %v29_v36  ;;  %482 = vmatpush.bf16.msra.mxu3 %v890_v38  ;;  %v924_v13 = vld [vmem:[%s1190_s2] ss:$0 sm:$0xff] }
  0x22   :  { %488 = vmatpush.bf16.msrb.mxu0 %v905_v32  ;;  %457 = vmatmul.bf16.vlgmr.msra.gmra.mxu1 %v30_v37  ;;  %v925_v31 = vld [vmem:[%s1192_s4] ss:$0 sm:$0xff] }
  0x23   :  { %501 = vmatpush.bf16.msrb.mxu1 %v913_v33  ;;  %470 = vmatmul.bf16.vlgmr.msra.gmra.mxu2 %v31_v43 }
  0x24   :  { %521 = vmatpush.bf16.msrb.mxu2 %v914_v39  ;;  %483 = vmatmul.bf16.vlgmr.msra.gmra.mxu3 %v32_v44 }
  0x25   :  { %597 = vmatpush.bf16.msrb.mxu3 %v922_v63 }
  0x26   :  { %489 = vmatpush.bf16.msrb.mxu0 %v904_v41 }
  0x27   :  { %502 = vmatpush.bf16.msrb.mxu1 %v912_v42 }
  0x29   :  { %598 = vmatpush.bf16.msrb.mxu3 %v921_v0 }
  0x2a   :  { %490 = vmatpush.bf16.msrb.mxu0 %v903_v45 }
  0x2b   :  { %503 = vmatpush.bf16.msrb.mxu1 %v911_v46 }
  0x2d   :  { %599 = vmatpush.bf16.msrb.mxu3 %v920_v1 }
  0x2e   :  { %491 = vmatpush.bf16.msrb.mxu0 %v902_v47 }
  0x2f   :  { %504 = vmatpush.bf16.msrb.mxu1 %v910_v48 }
  0x31   :  { %600 = vmatpush.bf16.msrb.mxu3 %v919_v2 }
  0x32   :  { %492 = vmatpush.bf16.msrb.mxu0 %v901_v49 }
  0x33   :  { %505 = vmatpush.bf16.msrb.mxu1 %v909_v50  ;;  %833 = vmatmul.msk.bf16.vlgmr.msrb.gmra.mxu2 %vm432_vm0, %v35_v54 }
  0x35   :  { %601 = vmatpush.bf16.msrb.mxu3 %v918_v3 }
  0x36   :  { %493 = vmatpush.bf16.msrb.mxu0 %v900_v52 }
  0x37   :  { %506 = vmatpush.bf16.msrb.mxu1 %v908_v53 }
  0x39   :  { %602 = vmatpush.bf16.msrb.mxu3 %v917_v4 }
  0x3a   :  { %494 = vmatpush.bf16.msrb.mxu0 %v899_v55 }
  0x3b   :  { %507 = vmatpush.bf16.msrb.mxu1 %v907_v56 }
  0x3d   :  { %603 = vmatpush.bf16.msrb.mxu3 %v916_v5 }
  0x3e   :  { %495 = vmatpush.bf16.msrb.mxu0 %v898_v57 }
  0x3f   :  { %508 = vmatpush.bf16.msrb.mxu1 %v906_v58 }
  0x41   :  { %496 = vmatmul.bf16.vlgmr.msrb.gmra.mxu0 %v33_v61  ;;  %604 = vmatpush.bf16.msrb.mxu3 %v915_v8 }
  0x42   :  { %509 = vmatmul.bf16.vlgmr.msrb.gmra.mxu1 %v34_v62 }
  0x9e   :  { %v445_v6 = vpop.f32.mrf.mxu0 }
  0x9f   :  { %v458_v7 = vpop.f32.mrf.mxu1  ;;  %v446_v14 = vadd.f32 %v924_v13, %v445_v6 }
  0xa1   :  { %v459_v17 = vadd.f32 %v458_v7, %v446_v14 }
  0xa6   :  { %v447_v9 = vpop.f32.mrf.mxu0  ;;  %v471_v11 = vpop.f32.mrf.mxu2 }
  0xa7   :  { %v460_v10 = vpop.f32.mrf.mxu1  ;;  %v484_v12 = vpop.f32.mrf.mxu3  ;;  %v472_v18 = vadd.f32 %v471_v11, %v459_v17 }
  0xa9   :  { %v485_v20 = vadd.f32 %v484_v12, %v472_v18 }
  0xae   :  { %v473_v15 = vpop.f32.mrf.mxu2 }
  0xaf   :  { %v486_v16 = vpop.f32.mrf.mxu3 }
  0xb6   :  { %v523_v19 = vpop.f32.mrf.mxu2 }
  0xbe   :  { %v497_v21 = vpop.f32.mrf.mxu0  ;;  %v525_v25 = vpop.f32.mrf.mxu2 }
  0xbf   :  { %v510_v22 = vpop.f32.mrf.mxu1  ;;  %v498_v23 = vadd.f32 %v497_v21, %v485_v20 }
  0xc1   :  { %v511_v24 = vadd.f32 %v510_v22, %v498_v23 }
  0xc3   :  { %v524_v26 = vadd.f32 %v523_v19, %v511_v24 }
  0xc5   :  { %v527_v27 = vmax.f32 %v524_v26, 0.0 }
  0xc6   :  { %v499_v28 = vpop.f32.mrf.mxu0 }
  0xc7   :  { %v512_v29 = vpop.f32.mrf.mxu1  ;;  %v528_v30 = vpack.c.bf16 %v527_v27, %v527_v27 }
  0xc9   :  { %605 = vmatmul.bf16.vlgmr.msrb.gmra.mxu3 %v528_v30 }
 0x14c   :  { %v606_v32 = vpop.f32.mrf.mxu3 }
 0x14d   :  { %v607_v33 = vadd.f32 %v925_v31, %v606_v32 }
 0x14f   :  { %610 = vmax.xlane.f32.xlu0 %v607_v33 }
 0x154   :  { %v608_v34 = vpop.f32.mrf.mxu3 }
 0x1c2   :  { %v611_v35 = vpop.xlane.xlu0 %610 }
 0x1c3   :  { %v612_v36 = vsub.f32 %v607_v33, %v611_v35 }
 0x1c5   :  { %v613_v37 = vmul.f32 1.442695, %v612_v36 }
 0x1c7   :  { %926 = vpow2.f32 %v613_v37 }
 0x1cd   :  { %v927_v38 = vpop.eup %926 }
 0x1ce   :  { %615 = vadd.xlane.f32.xlu0 %v927_v38 }
 0x241   :  { %v616_v39 = vpop.xlane.xlu0 %615 }
 0x242   :  { %928 = vlog2.f32 %v616_v39 }
 0x248   :  { %v929_v40 = vpop.eup %928 }
 0x249   :  { %v618_v41 = vmul.f32 0.6931472, %v929_v40 }
 0x24b   :  { %v619_v42 = vsub.f32 %v612_v36, %v618_v41 }
 0x24d   :  { %620 = vst [vmem:[#allocation2] sm:$0xff] %v619_v42 }
 0x24e   :  { %631 = dma.vmem_to_hbm [thread:$0]  %s627_s22, 128, %s629_s25, [#allocation3]  }
 0x24f   :  { %954 = dma.done.wait [#allocation3], 128  }
 0x250   :  { %955 = vsyncadd [#allocation3], 4294967168 }
 0x251   :  { %636 = vsyncpa [#allocation3], 1 }

</bundles_post_ra>
